<compile_context>
chip_gen: v7x
topology: tpu7x:2x2x1
jax: 0.10.0
libtpu: 0.0.40
codegen_flags: <defaults>
</compile_context>

<pallas_src>
import functools

import numpy as np
import jax
import jax.numpy as jnp
from jax.experimental import pallas as pl
from jax.experimental.pallas import tpu as pltpu


def _round_up(x, m):
    return ((x + m - 1) // m) * m


# ----------------------------- Pallas kernel --------------------------------
def _affine_grid_kernel(theta_ref, out_ref, *, H, W):
    # theta_ref: SMEM (B*6,) f32, laid out as input1.reshape(B*6) = [b, k, j].
    # out_ref  : VMEM (1, TR, 128) f32 block of the flat (B, 2*H*W) output,
    #            flat index g = (h*W + w)*2 + k.
    b = pl.program_id(0)
    j = pl.program_id(1)
    _, TR, L = out_ref.shape  # L == 128 (static)

    row = jax.lax.broadcasted_iota(jnp.int32, (1, TR, L), 1) + j * TR
    lane = jax.lax.broadcasted_iota(jnp.int32, (1, TR, L), 2)

    # Flat index covered by this tile: g = row*L + lane.  L is even, so:
    #   k = g % 2 = lane & 1,   pixel p = g // 2 = row*(L//2) + (lane >> 1)
    k_is0 = (lane & 1) == 0
    p = (row * (L // 2) + (lane >> 1)).astype(jnp.float32)

    # h = p // W, w = p % W done in f32.  floor((p+0.5)/W) is exact for
    # H*W up to ~2**22 pixels.  TODO(synk): switch to wider math for >2048x2048.
    h = jnp.floor((p + np.float32(0.5)) / np.float32(W))
    w = p - h * np.float32(W)
    y = h * np.float32(2.0 / H) - np.float32(1.0)   # grid[..., 0]
    x = w * np.float32(2.0 / W) - np.float32(1.0)   # grid[..., 1]

    base = b * 6
    t00 = theta_ref[base + 0]
    t01 = theta_ref[base + 1]
    t02 = theta_ref[base + 2]
    t10 = theta_ref[base + 3]
    t11 = theta_ref[base + 4]
    t12 = theta_ref[base + 5]

    ta = jnp.where(k_is0, t00, t10)
    tb = jnp.where(k_is0, t01, t11)
    tc = jnp.where(k_is0, t02, t12)

    out_ref[...] = ta * y + tb * x + tc


# ------------------------------ wrapper --------------------------------------
def affine_grid_gen_v2(input1, height, width, *, max_rows_per_tile=2048):
    B, K, J = input1.shape
    assert (K, J) == (2, 3)
    H, W = int(height), int(width)

    LANES = 128
    N = 2 * H * W                                  # flat elements per batch
    rows = -(-N // LANES)                          # ceil(N / 128)
    TR = min(max_rows_per_tile, _round_up(rows, 8))   # rows per tile (multiple of 8)
    Rp = _round_up(rows, TR)                       # padded row count (grid-divisible)

    theta_flat = input1.astype(jnp.float32).reshape(B * 6)

    kernel = functools.partial(_affine_grid_kernel, H=H, W=W)

    out_pad = pl.pallas_call(
        kernel,
        out_shape=jax.ShapeDtypeStruct((B, Rp, LANES), jnp.float32),
        grid_spec=pl.GridSpec(
            grid=(B, Rp // TR),
            in_specs=[
                # tiny theta lives in SMEM; scalar reads only
                pl.BlockSpec(memory_space=pltpu.MemorySpace.SMEM),
            ],
            out_specs=pl.BlockSpec((1, TR, LANES), lambda b, j: (b, j, 0)),
        ),
        compiler_params=pltpu.CompilerParams(
            dimension_semantics=("parallel", "parallel")),
    )(theta_flat)

    # The kernel already produced the (B, H, W, 2) layout flattened per batch;
    # only a (possible) tail slice + a free contiguous reshape remain.
    out_flat = out_pad.reshape(B, Rp * LANES)
    if Rp * LANES != N:
        out_flat = out_flat[:, :N]
    return out_flat.reshape(B, H, W, 2)


# --------------------------- pure-JAX reference ------------------------------
def _make_base_grid(height, width):
    # Value-identical to the module's np.arange(-1, 1, 2/H) construction but
    # immune to FP-rounding producing H+1 elements.
    y = (np.arange(height, dtype=np.float64) * (2.0 / height) - 1.0).astype(np.float32)
    x = (np.arange(width, dtype=np.float64) * (2.0 / width) - 1.0).astype(np.float32)
    g = np.zeros((height, width, 3), dtype=np.float32)
    g[:, :, 0] = y[:, None]
    g[:, :, 1] = x[None, :]
    g[:, :, 2] = 1.0
    return g


def _reference(input1, height, width):
    g = jnp.asarray(_make_base_grid(height, width))            # (H, W, 3)
    return jnp.einsum('hwj,bkj->bhwk', g, input1.astype(jnp.float32))


# ------------------------------- main ----------------------------------------
if __name__ == "__main__":
    key = jax.random.PRNGKey(0)

    # Test 1: module-sized small case.
    height, width, B = 16, 16, 2
    input1 = jax.random.normal(key, (B, 2, 3), jnp.float32)
    fn = jax.jit(functools.partial(affine_grid_gen_v2, height=height, width=width))
    out = jax.block_until_ready(fn(input1))
    ref = _reference(input1, height, width)
    assert out.shape == (B, height, width, 2)
    assert jnp.allclose(out, ref, atol=1e-5, rtol=1e-5)

    # Test 2: non-power-of-2 dims, padding, multiple row tiles, multiple batches.
    height2, width2, B2 = 29, 24, 3
    input2 = jax.random.normal(jax.random.PRNGKey(1), (B2, 2, 3), jnp.float32)
    out2 = jax.block_until_ready(
        affine_grid_gen_v2(input2, height2, width2, max_rows_per_tile=8))
    ref2 = _reference(input2, height2, width2)
    assert out2.shape == (B2, height2, width2, 2)
    assert jnp.allclose(out2, ref2, atol=1e-5, rtol=1e-5)

    print("KERNEL_OK")
</pallas_src>

<mosaic_0001>
module attributes {stable_mosaic.version = 11 : i64} {
  func.func @_affine_grid_kernel(%arg0: i32, %arg1: i32, %arg2: memref<12xf32, #tpu.memory_space<smem>>, %arg3: memref<1x8x128xf32, #tpu.memory_space<vmem>>) attributes {dimension_semantics = [#tpu.dimension_semantics<parallel>, #tpu.dimension_semantics<parallel>], iteration_bounds = array<i64: 2, 1>, scalar_prefetch = 0 : i64, scratch_operands = 0 : i64, tpu.core_type = #tpu.core_type<tc>, window_params = [{transform_indices = @transform_0, window_bounds = array<i64: 12>}, {transform_indices = @transform_1, window_bounds = array<i64: 1, 8, 128>}]} {
    %0 = tpu.iota {dimensions = array<i32: 1>} : vector<1x8x128xi32>
    %c8_i32 = arith.constant 8 : i32
    %1 = arith.muli %arg1, %c8_i32 : i32
    %2 = vector.broadcast %1 : i32 to vector<1x8x128xi32>
    %3 = arith.addi %0, %2 : vector<1x8x128xi32>
    %4 = tpu.iota {dimensions = array<i32: 2>} : vector<1x8x128xi32>
    %c1_i32 = arith.constant 1 : i32
    %5 = vector.broadcast %c1_i32 : i32 to vector<1x8x128xi32>
    %6 = arith.andi %4, %5 : vector<1x8x128xi32>
    %c0_i32 = arith.constant 0 : i32
    %7 = vector.broadcast %c0_i32 : i32 to vector<1x8x128xi32>
    %8 = arith.cmpi eq, %6, %7 : vector<1x8x128xi32>
    %c64_i32 = arith.constant 64 : i32
    %9 = vector.broadcast %c64_i32 : i32 to vector<1x8x128xi32>
    %10 = arith.muli %3, %9 : vector<1x8x128xi32>
    %c1_i32_0 = arith.constant 1 : i32
    %11 = vector.broadcast %c1_i32_0 : i32 to vector<1x8x128xi32>
    %12 = arith.shrsi %4, %11 : vector<1x8x128xi32>
    %13 = arith.addi %10, %12 : vector<1x8x128xi32>
    %14 = arith.sitofp %13 : vector<1x8x128xi32> to vector<1x8x128xf32>
    %cst = arith.constant 5.000000e-01 : f32
    %15 = vector.broadcast %cst : f32 to vector<1x8x128xf32>
    %16 = arith.addf %14, %15 : vector<1x8x128xf32>
    %cst_1 = arith.constant 1.600000e+01 : f32
    %17 = vector.broadcast %cst_1 : f32 to vector<1x8x128xf32>
    %18 = arith.divf %16, %17 : vector<1x8x128xf32>
    %19 = math.floor %18 : vector<1x8x128xf32>
    %cst_2 = arith.constant 1.600000e+01 : f32
    %20 = vector.broadcast %cst_2 : f32 to vector<1x8x128xf32>
    %21 = arith.mulf %19, %20 : vector<1x8x128xf32>
    %22 = arith.subf %14, %21 : vector<1x8x128xf32>
    %cst_3 = arith.constant 1.250000e-01 : f32
    %23 = vector.broadcast %cst_3 : f32 to vector<1x8x128xf32>
    %24 = arith.mulf %19, %23 : vector<1x8x128xf32>
    %cst_4 = arith.constant 1.000000e+00 : f32
    %25 = vector.broadcast %cst_4 : f32 to vector<1x8x128xf32>
    %26 = arith.subf %24, %25 : vector<1x8x128xf32>
    %cst_5 = arith.constant 1.250000e-01 : f32
    %27 = vector.broadcast %cst_5 : f32 to vector<1x8x128xf32>
    %28 = arith.mulf %22, %27 : vector<1x8x128xf32>
    %cst_6 = arith.constant 1.000000e+00 : f32
    %29 = vector.broadcast %cst_6 : f32 to vector<1x8x128xf32>
    %30 = arith.subf %28, %29 : vector<1x8x128xf32>
    %c6_i32 = arith.constant 6 : i32
    %31 = arith.muli %arg0, %c6_i32 : i32
    %c0_i32_7 = arith.constant 0 : i32
    %32 = arith.addi %31, %c0_i32_7 : i32
    %33 = arith.index_cast %32 : i32 to index
    %34 = memref.load %arg2[%33] : memref<12xf32, #tpu.memory_space<smem>>
    %c1_i32_8 = arith.constant 1 : i32
    %35 = arith.addi %31, %c1_i32_8 : i32
    %36 = arith.index_cast %35 : i32 to index
    %37 = memref.load %arg2[%36] : memref<12xf32, #tpu.memory_space<smem>>
    %c2_i32 = arith.constant 2 : i32
    %38 = arith.addi %31, %c2_i32 : i32
    %39 = arith.index_cast %38 : i32 to index
    %40 = memref.load %arg2[%39] : memref<12xf32, #tpu.memory_space<smem>>
    %c3_i32 = arith.constant 3 : i32
    %41 = arith.addi %31, %c3_i32 : i32
    %42 = arith.index_cast %41 : i32 to index
    %43 = memref.load %arg2[%42] : memref<12xf32, #tpu.memory_space<smem>>
    %c4_i32 = arith.constant 4 : i32
    %44 = arith.addi %31, %c4_i32 : i32
    %45 = arith.index_cast %44 : i32 to index
    %46 = memref.load %arg2[%45] : memref<12xf32, #tpu.memory_space<smem>>
    %c5_i32 = arith.constant 5 : i32
    %47 = arith.addi %31, %c5_i32 : i32
    %48 = arith.index_cast %47 : i32 to index
    %49 = memref.load %arg2[%48] : memref<12xf32, #tpu.memory_space<smem>>
    %50 = vector.broadcast %34 : f32 to vector<1x8x128xf32>
    %51 = vector.broadcast %43 : f32 to vector<1x8x128xf32>
    %52 = arith.select %8, %50, %51 : vector<1x8x128xi1>, vector<1x8x128xf32>
    %53 = vector.broadcast %37 : f32 to vector<1x8x128xf32>
    %54 = vector.broadcast %46 : f32 to vector<1x8x128xf32>
    %55 = arith.select %8, %53, %54 : vector<1x8x128xi1>, vector<1x8x128xf32>
    %56 = vector.broadcast %40 : f32 to vector<1x8x128xf32>
    %57 = vector.broadcast %49 : f32 to vector<1x8x128xf32>
    %58 = arith.select %8, %56, %57 : vector<1x8x128xi1>, vector<1x8x128xf32>
    %59 = arith.mulf %52, %26 : vector<1x8x128xf32>
    %60 = arith.mulf %55, %30 : vector<1x8x128xf32>
    %61 = arith.addf %59, %60 : vector<1x8x128xf32>
    %62 = arith.addf %61, %58 : vector<1x8x128xf32>
    %c0 = arith.constant 0 : index
    %c0_9 = arith.constant 0 : index
    %c0_10 = arith.constant 0 : index
    %63 = vector.load %arg3[%c0, %c0_9, %c0_10] : memref<1x8x128xf32, #tpu.memory_space<vmem>>, vector<1x8x128xf32>
    tpu.vector_store %arg3[%c0, %c0_9, %c0_10], %62 {strides = array<i32>} : memref<1x8x128xf32, #tpu.memory_space<vmem>>, vector<1x8x128xf32>,
    return
  }
  func.func @transform_0(%arg0: i32, %arg1: i32) -> i32 {
    %c0_i32 = arith.constant 0 : i32
    %c0_i32_0 = arith.constant 0 : i32
    return %c0_i32 : i32
  }
  func.func @transform_1(%arg0: i32, %arg1: i32) -> (i32, i32, i32) {
    %c0_i32 = arith.constant 0 : i32
    %c0_i32_0 = arith.constant 0 : i32
    return %arg0, %arg1, %c0_i32 : i32, i32, i32
  }
}

</mosaic_0001>

<bundles_post_ra>
// kernel: affine_grid_gen_v2.1
= control target key start
LH: loop header
LB: loop body
LE: loop exit
PB: predicated region body
PF: predicated region fallthrough
CT: control target
= control target key end

     0   :  { %6 = vsyncpa [#allocation3], 0  ;;  %s350_s6 = smov 0   ;;  %s352_s7 = smov 0   ;;  %s417_s0 = inlined_call_operand.vmem [shape: f32[12], index: 0, kind: input, shape index: {}]   ;;  %s418_s1 = inlined_call_operand.vmem [shape: f32[2,8,128], index: 1, kind: output, shape index: {}]  }
   0x1   :  { %s354_s8 = smov 0  }
   0x2 LB: > { %s250_s9 = sadd.s32 4294967295, %s337_s8   ;;  %s24_s10 = sadd.s32 1, %s333_s7  ;;  %s337_s8 = sphi %s354_s8, %s12_s8   ;;  %s333_s7 = sphi %s352_s7, %s424_s7   ;;  %s329_s6 = sphi %s350_s6, %s423_s6  }
   0x3   : > { %p26_p0 = scmp.ge.s32.totalorder %s24_s10, 2  ;;  %p252_p1 = scmp.ge.s32.totalorder %s337_s8, 1 }
   0x4   : > { %p78_p2 = scmp.lt.s32.totalorder %s337_s8, 3  ;;  %p375_p4 = scmp.eq.s32.totalorder %s250_s9, 0 }
   0x5   : > { %s426_s10 = smov (%p26_p0, %s24_s10), 0  ;;  %s91_s15 = sshll.u32 %s417_s0, 4  ;;  %s92_s15 = int_to_ptr.vmem [resolvable:$true] %s91_s15 }
   0x6   : > { %p371_p3 = pnand %p252_p1, %p78_p2  ;;  %s296_s16 = scalar_lea.vmem %s92_s15, 16 }
   0x7   : > { %p297_p7 = scmp.ne.s32.totalorder %s92_s15, %s296_s16  ;;  %p304_p11 = scmp.lt.s32.totalorder %s92_s15, %s92_s15 }
   0x8   : > { %p265_p5 = pneg %p371_p3  ;;  %p305_p12 = scmp.lt.s32.totalorder %s296_s16, %s296_s16 }
   0xa   : > { %p266_p6 = pnand %p375_p4, %p265_p5  ;;  %p306_p13 = por %p305_p12, %p304_p11 }
   0xc   : > { %p298_p8 = pneg %p266_p6 }
   0xe   : > { %p299_p9 = pnand %p298_p8, %p297_p7 }
  0x10   : > { %p300_p10 = pneg %p299_p9 }
  0x12   : > { %p307_p0 = pnand %p306_p13, %p300_p10 }
  0x14   : > { %310 = shalt.err (!%p307_p0)
}
  0x15   : > { %s339_s17 = smov [#allocation2]   ;;  %104 = sbr.rel (%p371_p3) target bundleno = 62 (0x3e), region = 24 }
  0x16   : > { %268 = dma.vmem_to_smem (!%p266_p6), %s92_s15, 16, %s339_s17, [#allocation3]  }
  0x1c   : > { %324 = dma.done.wait (%p375_p4), [#allocation3], 16  }
  0x1d   : > { %326 = vsyncadd (%p375_p4), [#allocation3], 4294967280 }
  0x1e   : > { %110 = sfence }
  0x1f   : > { %v129_v0 = vlaneseq  ;;  %s152_s18 = smul.u32 6, %s329_s6  ;;  %p122_p1 = scmp.lt.s32.totalorder %s329_s6, 1 }
  0x21   : > { %v130_v1 = vshrl.u32 %v129_v0, 7  ;;  %v135_v2 = vand.u32 127, %v129_v0  ;;  %s158_s19 = sadd.s32 3, %s152_s18  ;;  %s154_s20 = sadd.s32 1, %s152_s18 }
  0x22   : > { %s160_s21 = sadd.s32 4, %s152_s18  ;;  %s153_s22 = sld [smem:[#allocation2 + %s152_s18]] }
  0x23   : > { %v138_v3 = vmul.u32 64, %v130_v1  ;;  %v139_v4 = vshra.s32 %v135_v2, 1  ;;  %s159_s23 = sld [smem:[#allocation2 + %s158_s19]]  ;;  %v136_v8 = vand.u32 1, %v135_v2  ;;  %s156_s26 = sadd.s32 2, %s152_s18 }
  0x24   : > { %s155_s24 = sld [smem:[#allocation2 + %s154_s20]]  ;;  %s162_s27 = sadd.s32 5, %s152_s18 }
  0x25   : > { %v140_v5 = vadd.s32 %v139_v4, %v138_v3  ;;  %s161_s25 = sld [smem:[#allocation2 + %s160_s21]]  ;;  %vm393_vm0 = vcmp.eq.s32.totalorder %v136_v8, 0  ;;  %s428_s6 = smov (!%p122_p1, %s329_s6), 1 }
  0x26   : > { %s157_s28 = sld [smem:[#allocation2 + %s156_s26]]  ;;  %s256_s30 = sshll.u32 %s428_s6, 3 }
  0x27   : > { %v141_v6 = vcvt.s32.f32 %v140_v5  ;;  %s163_s29 = sld [smem:[#allocation2 + %s162_s27]]  ;;  %s128_s4 = scalar_lea.vmem %s418_s1, %s256_s30 }
  0x28   : > { %v164_v14 = vstv %s153_s22 }
  0x29   : > { %v142_v7 = vadd.f32 0.5, %v141_v6  ;;  %v165_v15 = vstv %s159_s23 }
  0x2a   : > { %v167_v18 = vstv %s155_s24  ;;  %v166_v20 = vsel %vm393_vm0, %v164_v14, %v165_v15 }
  0x2b   : > { %v144_v9 = vmul.f32 0.0625, %v142_v7  ;;  %v168_v19 = vstv %s161_s25 }
  0x2c   : > { %v169_v22 = vsel %vm393_vm0, %v167_v18, %v168_v19  ;;  %v170_v24 = vstv %s157_s28 }
  0x2d   : > { %v145_v10 = vfloor.f32 %v144_v9  ;;  %v171_v25 = vstv %s163_s29 }
  0x2e   : > { %v172_v28 = vsel %vm393_vm0, %v170_v24, %v171_v25 }
  0x2f   : > { %v146_v12 = vmul.f32 16.0, %v145_v10  ;;  %v148_v13 = vmul.f32 0.125, %v145_v10 }
  0x31   : > { %v147_v16 = vsub.f32 %v141_v6, %v146_v12  ;;  %v257_v17 = vadd.f32 -1.0, %v148_v13 }
  0x33   : > { %v150_v21 = vmul.f32 0.125, %v147_v16  ;;  %v173_v26 = vmul.f32 %v257_v17, %v166_v20 }
  0x35   : > { %v258_v23 = vadd.f32 -1.0, %v150_v21 }
  0x37   : > { %v174_v27 = vmul.f32 %v258_v23, %v169_v22 }
  0x39   : > { %v175_v29 = vadd.f32 %v174_v27, %v173_v26 }
  0x3b   : > { %v176_v30 = vadd.f32 %v175_v29, %v172_v28 }
  0x3d   : > { %177 = vst [vmem:[%s128_s4] sm:$0xff] %v176_v30 }
  0x3e PF: > { %s12_s8 = sadd.s32 1, %s337_s8   ;;  %s423_s6 = smov %s333_s7 }
  0x3f   : > { %p9_p2 = scmp.ge.s32.totalorder %s12_s8, 4   ;;  %s424_s7 = smov %s426_s10 }
  0x41   :  { %11 = sbr.rel (!%p9_p2) target bundleno = 2 (0x2), region = 56 }
  0x48   :  { %203 = vsyncpa [#allocation3], 1 }
  0x49   :  { %205 = vsyncpa [#allocation3 + $0x1], 1 }

</bundles_post_ra>
